<compile_context>
chip_gen: v5e
topology: v5e:2x2
jax: 0.10.0
libtpu: 0.0.40
codegen_flags: <defaults>
</compile_context>

<pallas_src>
import functools

import jax
import jax.numpy as jnp
from jax import lax
from jax.experimental import pallas as pl
from jax.experimental.pallas import tpu as pltpu


def _round_up(x, m):
    return (x + m - 1) // m * m


# ---------------------------------------------------------------------------
# Pallas kernel: build stacked shifted RHS in VMEM scratch, one MXU matmul.
# ---------------------------------------------------------------------------
def _instconv_kernel(x_ref, w_ref, b_ref, o_ref, rhs_ref, *, kh, kw, wp, cin_p, l_acc):
    # x_ref:   (1, Cin_p, L_in)        padded + spatially-flattened input (compute dtype)
    # w_ref:   (Cout, KH*KW*Cin_p)     folded conv weights, tap-major contraction axis
    # b_ref:   (Cout, 1)               f32 biases
    # o_ref:   (1, Cout, L_acc)        dense stride-1 conv output, lane-dense, f32
    # rhs_ref: (KH*KW*Cin_p, L_acc)    VMEM scratch holding the stacked shifted slices
    for i in range(kh):
        for j in range(kw):
            t = i * kw + j
            off = i * wp + j
            # Slice the *ref* directly (one shifted load per tap); never slice a
            # pre-loaded slab (avoids repeated whole-slab lane-rotated copies).
            rhs_ref[t * cin_p:(t + 1) * cin_p, :] = x_ref[0, :, off:off + l_acc]

    # Single MXU contraction over K = KH*KW*Cin_p (accumulation inside the MXU).
    acc = jnp.dot(w_ref[...], rhs_ref[...], preferred_element_type=jnp.float32)
    o_ref[0] = (acc + b_ref[...]).astype(o_ref.dtype)   # one bias add, lane broadcast


# ---------------------------------------------------------------------------
# Wrapper: fold instance weights, flatten/pad input, call the kernel.
# ---------------------------------------------------------------------------
@functools.partial(jax.jit,
                   static_argnames=("kernel_size", "stride", "padding", "compute_dtype"))
def instconv2dv3_forward(x, inst_weight, conv_weight, conv_bias, *,
                         kernel_size, stride=1, padding=0,
                         compute_dtype=jnp.bfloat16):
    """
    x:           (N, Cin, H, W)        float32, NCHW
    inst_weight: (Cout, Cin)           module's self.weight
    conv_weight: (Cout, Cin, KH, KW)   stacked conv_i weights (each has 1 out channel)
    conv_bias:   (Cout,)               stacked conv_i biases
    returns:     (N, Cout, Hout, Wout) NCHW, float32
    """
    N, Cin, H, W = x.shape
    Cout = inst_weight.shape[0]
    KH = KW = kernel_size
    Hp, Wp = H + 2 * padding, W + 2 * padding
    Hout = (Hp - KH) // stride + 1
    Wout = (Wp - KW) // stride + 1
    Hd = Hp - KH + 1                 # dense (stride-1) output rows computed in-kernel

    # Channel padding so per-tap stores into the RHS scratch stay tile-aligned
    # (8 sublanes for 32-bit, 16 for 16-bit dtypes).
    pack = 8 if jnp.dtype(compute_dtype).itemsize == 4 else 16
    Cin_p = _round_up(Cin, pack)

    # Cumulative in-place scaling from _dropout: scale[0]=1,
    # scale[k] = prod_{j=1..k} relu(inst_weight[j])  (per input channel), in f32.
    relu_w = jnp.maximum(inst_weight.astype(jnp.float32), 0.0)            # (Cout, Cin)
    scale = jnp.concatenate(
        [jnp.ones((1, Cin), jnp.float32), jnp.cumprod(relu_w[1:], axis=0)], axis=0)

    # Fold the per-output-channel input scaling into the conv weights, pad Cin,
    # and lay out as a single 2-D matrix: column = (i*KW + j)*Cin_p + c.
    w_eff = conv_weight.astype(jnp.float32) * scale[:, :, None, None]     # (Cout,Cin,KH,KW)
    w_eff = jnp.pad(w_eff, ((0, 0), (0, Cin_p - Cin), (0, 0), (0, 0)))
    w2d = (w_eff.transpose(0, 2, 3, 1)
           .reshape(Cout, KH * KW * Cin_p).astype(compute_dtype))
    b2 = conv_bias.astype(jnp.float32).reshape(Cout, 1)

    # Lane-dense dense-conv length and the input slab length it needs.
    L_acc = _round_up(Hd * Wp, 128)
    L_in = _round_up((KH - 1) * Wp + (KW - 1) + L_acc, 128)
    assert L_in >= L_acc + (KH - 1) * Wp + (KW - 1)   # tail reads stay in-bounds

    # Pad spatially + channels, flatten spatial dims (free reshape), tail-pad to L_in.
    xp = jnp.pad(x.astype(jnp.float32),
                 ((0, 0), (0, Cin_p - Cin), (padding, padding), (padding, padding)))
    xf = xp.reshape(N, Cin_p, Hp * Wp)
    xf = jnp.pad(xf, ((0, 0), (0, 0), (0, L_in - Hp * Wp))).astype(compute_dtype)

    kernel = functools.partial(_instconv_kernel, kh=KH, kw=KW, wp=Wp,
                               cin_p=Cin_p, l_acc=L_acc)

    isz = jnp.dtype(compute_dtype).itemsize
    flops = 2 * N * Cout * Cin * KH * KW * Hd * Wp     # garbage cols included (advisory)
    bytes_accessed = (isz * (N * Cin_p * L_in + Cout * KH * KW * Cin_p)
                      + 4 * Cout + 4 * N * Cout * L_acc)

    o = pl.pallas_call(
        kernel,
        out_shape=jax.ShapeDtypeStruct((N, Cout, L_acc), jnp.float32),
        grid_spec=pltpu.PrefetchScalarGridSpec(
            num_scalar_prefetch=0,
            grid=(N,),
            in_specs=[
                pl.BlockSpec((1, Cin_p, L_in), lambda n: (n, 0, 0)),
                pl.BlockSpec((Cout, KH * KW * Cin_p), lambda n: (0, 0)),
                pl.BlockSpec((Cout, 1), lambda n: (0, 0)),
            ],
            out_specs=pl.BlockSpec((1, Cout, L_acc), lambda n: (n, 0, 0)),
            scratch_shapes=[pltpu.VMEM((KH * KW * Cin_p, L_acc), compute_dtype)],
        ),
        compiler_params=pltpu.CompilerParams(
            dimension_semantics=("parallel",)),
        cost_estimate=pl.CostEstimate(flops=flops, transcendentals=0,
                                      bytes_accessed=bytes_accessed),
    )(xf, w2d, b2)

    # Drop lane padding (free reshape + small slice), subsample for stride.
    o = o[:, :, :Hd * Wp].reshape(N, Cout, Hd, Wp)
    out = o[:, :, ::stride, ::stride][:, :, :Hout, :Wout]
    return out


# ---------------------------------------------------------------------------
# Pure-JAX reference (sanity check) — rounds inputs the same way as the kernel.
# ---------------------------------------------------------------------------
def _reference(x, inst_weight, conv_weight, conv_bias, *, stride, padding,
               compute_dtype=jnp.float32):
    Cout, Cin = inst_weight.shape
    relu_w = jnp.maximum(inst_weight.astype(jnp.float32), 0.0)
    scale = jnp.concatenate(
        [jnp.ones((1, Cin), jnp.float32), jnp.cumprod(relu_w[1:], axis=0)], axis=0)
    w_eff = conv_weight.astype(jnp.float32) * scale[:, :, None, None]
    w_eff = w_eff.astype(compute_dtype).astype(jnp.float32)
    xr = x.astype(compute_dtype).astype(jnp.float32)
    out = lax.conv_general_dilated(
        xr, w_eff, window_strides=(stride, stride),
        padding=[(padding, padding), (padding, padding)],
        dimension_numbers=("NCHW", "OIHW", "NCHW"),
        precision=lax.Precision.HIGHEST)
    return out + conv_bias.reshape(1, Cout, 1, 1)


if __name__ == "__main__":
    # Small shapes consistent with the module.
    N, Cin, Cout, H, W = 2, 4, 4, 16, 16
    kernel_size, stride, padding = 3, 1, 1

    key = jax.random.PRNGKey(0)
    k1, k2, k3, k4 = jax.random.split(key, 4)
    x = jax.random.normal(k1, (N, Cin, H, W), jnp.float32)
    inst_weight = jax.random.normal(k2, (Cout, Cin), jnp.float32)           # self.weight
    conv_weight = 0.1 * jax.random.normal(
        k3, (Cout, Cin, kernel_size, kernel_size), jnp.float32)             # conv_i weights
    conv_bias = 0.1 * jax.random.normal(k4, (Cout,), jnp.float32)           # conv_i biases

    # 1) f32 path: exact check against the reference.
    out_f32 = instconv2dv3_forward(x, inst_weight, conv_weight, conv_bias,
                                   kernel_size=kernel_size, stride=stride,
                                   padding=padding, compute_dtype=jnp.float32)
    out_f32 = jax.block_until_ready(out_f32)
    ref_f32 = _reference(x, inst_weight, conv_weight, conv_bias,
                         stride=stride, padding=padding, compute_dtype=jnp.float32)
    assert out_f32.shape == (N, Cout, H, W), out_f32.shape
    err = float(jnp.max(jnp.abs(out_f32 - ref_f32)))
    assert jnp.allclose(out_f32, ref_f32, atol=1e-4, rtol=1e-4), err

    # 2) bf16-input fast path (default): compare against a bf16-rounded reference.
    out_bf = instconv2dv3_forward(x, inst_weight, conv_weight, conv_bias,
                                  kernel_size=kernel_size, stride=stride,
                                  padding=padding)
    out_bf = jax.block_until_ready(out_bf)
    ref_bf = _reference(x, inst_weight, conv_weight, conv_bias,
                        stride=stride, padding=padding, compute_dtype=jnp.bfloat16)
    err_bf = float(jnp.max(jnp.abs(out_bf - ref_bf)))
    assert jnp.allclose(out_bf, ref_bf, atol=2e-3, rtol=2e-3), err_bf

    # 3) stride=2 / padding=0 path (generic dense-compute + subsample).
    out_s2 = instconv2dv3_forward(x, inst_weight, conv_weight, conv_bias,
                                  kernel_size=kernel_size, stride=2, padding=0,
                                  compute_dtype=jnp.float32)
    out_s2 = jax.block_until_ready(out_s2)
    ref_s2 = _reference(x, inst_weight, conv_weight, conv_bias,
                        stride=2, padding=0, compute_dtype=jnp.float32)
    assert out_s2.shape == ref_s2.shape, (out_s2.shape, ref_s2.shape)
    err_s2 = float(jnp.max(jnp.abs(out_s2 - ref_s2)))
    assert jnp.allclose(out_s2, ref_s2, atol=1e-4, rtol=1e-4), err_s2

    print("KERNEL_OK")
</pallas_src>

<mosaic_0001>
module attributes {stable_mosaic.version = 11 : i64} {
  func.func @_instconv_kernel(%arg0: i32, %arg1: memref<1x8x512xf32, #tpu.memory_space<vmem>>, %arg2: memref<4x72xf32, #tpu.memory_space<vmem>>, %arg3: memref<4x1xf32, #tpu.memory_space<vmem>>, %arg4: memref<1x4x384xf32, #tpu.memory_space<vmem>>, %arg5: memref<72x384xf32, #tpu.memory_space<vmem>>) attributes {dimension_semantics = [#tpu.dimension_semantics<parallel>], iteration_bounds = array<i64: 2>, scalar_prefetch = 0 : i64, scratch_operands = 1 : i64, tpu.core_type = #tpu.core_type<tc>, window_params = [{transform_indices = @transform_0, window_bounds = array<i64: 1, 8, 512>}, {pipeline_mode = #tpu.pipeline_mode<synchronous>, transform_indices = @transform_1, window_bounds = array<i64: 4, 72>}, {pipeline_mode = #tpu.pipeline_mode<synchronous>, transform_indices = @transform_2, window_bounds = array<i64: 4, 1>}, {transform_indices = @transform_3, window_bounds = array<i64: 1, 4, 384>}]} {
    %c0 = arith.constant 0 : index
    %c0_0 = arith.constant 0 : index
    %c0_1 = arith.constant 0 : index
    %0 = vector.load %arg1[%c0, %c0_0, %c0_1] : memref<1x8x512xf32, #tpu.memory_space<vmem>>, vector<1x8x384xf32>
    %1 = vector.shape_cast %0 : vector<1x8x384xf32> to vector<8x384xf32>
    %c0_2 = arith.constant 0 : index
    %c0_3 = arith.constant 0 : index
    %2 = vector.load %arg5[%c0_2, %c0_3] : memref<72x384xf32, #tpu.memory_space<vmem>>, vector<8x384xf32>
    tpu.vector_store %arg5[%c0_2, %c0_3], %1 {strides = array<i32>} : memref<72x384xf32, #tpu.memory_space<vmem>>, vector<8x384xf32>,
    %c0_4 = arith.constant 0 : index
    %c0_5 = arith.constant 0 : index
    %c1 = arith.constant 1 : index
    %3 = vector.load %arg1[%c0_4, %c0_5, %c1] : memref<1x8x512xf32, #tpu.memory_space<vmem>>, vector<1x8x384xf32>
    %4 = vector.shape_cast %3 : vector<1x8x384xf32> to vector<8x384xf32>
    %c8 = arith.constant 8 : index
    %c0_6 = arith.constant 0 : index
    %5 = vector.load %arg5[%c8, %c0_6] : memref<72x384xf32, #tpu.memory_space<vmem>>, vector<8x384xf32>
    tpu.vector_store %arg5[%c8, %c0_6], %4 {strides = array<i32>} : memref<72x384xf32, #tpu.memory_space<vmem>>, vector<8x384xf32>,
    %c0_7 = arith.constant 0 : index
    %c0_8 = arith.constant 0 : index
    %c2 = arith.constant 2 : index
    %6 = vector.load %arg1[%c0_7, %c0_8, %c2] : memref<1x8x512xf32, #tpu.memory_space<vmem>>, vector<1x8x384xf32>
    %7 = vector.shape_cast %6 : vector<1x8x384xf32> to vector<8x384xf32>
    %c16 = arith.constant 16 : index
    %c0_9 = arith.constant 0 : index
    %8 = vector.load %arg5[%c16, %c0_9] : memref<72x384xf32, #tpu.memory_space<vmem>>, vector<8x384xf32>
    tpu.vector_store %arg5[%c16, %c0_9], %7 {strides = array<i32>} : memref<72x384xf32, #tpu.memory_space<vmem>>, vector<8x384xf32>,
    %c0_10 = arith.constant 0 : index
    %c0_11 = arith.constant 0 : index
    %c18 = arith.constant 18 : index
    %9 = vector.load %arg1[%c0_10, %c0_11, %c18] : memref<1x8x512xf32, #tpu.memory_space<vmem>>, vector<1x8x384xf32>
    %10 = vector.shape_cast %9 : vector<1x8x384xf32> to vector<8x384xf32>
    %c24 = arith.constant 24 : index
    %c0_12 = arith.constant 0 : index
    %11 = vector.load %arg5[%c24, %c0_12] : memref<72x384xf32, #tpu.memory_space<vmem>>, vector<8x384xf32>
    tpu.vector_store %arg5[%c24, %c0_12], %10 {strides = array<i32>} : memref<72x384xf32, #tpu.memory_space<vmem>>, vector<8x384xf32>,
    %c0_13 = arith.constant 0 : index
    %c0_14 = arith.constant 0 : index
    %c19 = arith.constant 19 : index
    %12 = vector.load %arg1[%c0_13, %c0_14, %c19] : memref<1x8x512xf32, #tpu.memory_space<vmem>>, vector<1x8x384xf32>
    %13 = vector.shape_cast %12 : vector<1x8x384xf32> to vector<8x384xf32>
    %c32 = arith.constant 32 : index
    %c0_15 = arith.constant 0 : index
    %14 = vector.load %arg5[%c32, %c0_15] : memref<72x384xf32, #tpu.memory_space<vmem>>, vector<8x384xf32>
    tpu.vector_store %arg5[%c32, %c0_15], %13 {strides = array<i32>} : memref<72x384xf32, #tpu.memory_space<vmem>>, vector<8x384xf32>,
    %c0_16 = arith.constant 0 : index
    %c0_17 = arith.constant 0 : index
    %c20 = arith.constant 20 : index
    %15 = vector.load %arg1[%c0_16, %c0_17, %c20] : memref<1x8x512xf32, #tpu.memory_space<vmem>>, vector<1x8x384xf32>
    %16 = vector.shape_cast %15 : vector<1x8x384xf32> to vector<8x384xf32>
    %c40 = arith.constant 40 : index
    %c0_18 = arith.constant 0 : index
    %17 = vector.load %arg5[%c40, %c0_18] : memref<72x384xf32, #tpu.memory_space<vmem>>, vector<8x384xf32>
    tpu.vector_store %arg5[%c40, %c0_18], %16 {strides = array<i32>} : memref<72x384xf32, #tpu.memory_space<vmem>>, vector<8x384xf32>,
    %c0_19 = arith.constant 0 : index
    %c0_20 = arith.constant 0 : index
    %c36 = arith.constant 36 : index
    %18 = vector.load %arg1[%c0_19, %c0_20, %c36] : memref<1x8x512xf32, #tpu.memory_space<vmem>>, vector<1x8x384xf32>
    %19 = vector.shape_cast %18 : vector<1x8x384xf32> to vector<8x384xf32>
    %c48 = arith.constant 48 : index
    %c0_21 = arith.constant 0 : index
    %20 = vector.load %arg5[%c48, %c0_21] : memref<72x384xf32, #tpu.memory_space<vmem>>, vector<8x384xf32>
    tpu.vector_store %arg5[%c48, %c0_21], %19 {strides = array<i32>} : memref<72x384xf32, #tpu.memory_space<vmem>>, vector<8x384xf32>,
    %c0_22 = arith.constant 0 : index
    %c0_23 = arith.constant 0 : index
    %c37 = arith.constant 37 : index
    %21 = vector.load %arg1[%c0_22, %c0_23, %c37] : memref<1x8x512xf32, #tpu.memory_space<vmem>>, vector<1x8x384xf32>
    %22 = vector.shape_cast %21 : vector<1x8x384xf32> to vector<8x384xf32>
    %c56 = arith.constant 56 : index
    %c0_24 = arith.constant 0 : index
    %23 = vector.load %arg5[%c56, %c0_24] : memref<72x384xf32, #tpu.memory_space<vmem>>, vector<8x384xf32>
    tpu.vector_store %arg5[%c56, %c0_24], %22 {strides = array<i32>} : memref<72x384xf32, #tpu.memory_space<vmem>>, vector<8x384xf32>,
    %c0_25 = arith.constant 0 : index
    %c0_26 = arith.constant 0 : index
    %c38 = arith.constant 38 : index
    %24 = vector.load %arg1[%c0_25, %c0_26, %c38] : memref<1x8x512xf32, #tpu.memory_space<vmem>>, vector<1x8x384xf32>
    %25 = vector.shape_cast %24 : vector<1x8x384xf32> to vector<8x384xf32>
    %c64 = arith.constant 64 : index
    %c0_27 = arith.constant 0 : index
    %26 = vector.load %arg5[%c64, %c0_27] : memref<72x384xf32, #tpu.memory_space<vmem>>, vector<8x384xf32>
    tpu.vector_store %arg5[%c64, %c0_27], %25 {strides = array<i32>} : memref<72x384xf32, #tpu.memory_space<vmem>>, vector<8x384xf32>,
    %c0_28 = arith.constant 0 : index
    %c0_29 = arith.constant 0 : index
    %27 = vector.load %arg2[%c0_28, %c0_29] : memref<4x72xf32, #tpu.memory_space<vmem>>, vector<4x72xf32>
    %c0_30 = arith.constant 0 : index
    %c0_31 = arith.constant 0 : index
    %28 = vector.load %arg5[%c0_30, %c0_31] : memref<72x384xf32, #tpu.memory_space<vmem>>, vector<72x384xf32>
    %cst = arith.constant dense<0.000000e+00> : vector<4x384xf32>
    %29 = tpu.matmul %27, %28, %cst {dimension_numbers = #tpu.dot_dimension_numbers<[1], [0], [0], [1], [0, 0, 1, 1], [], []>} : vector<4x72xf32>, vector<72x384xf32>, vector<4x384xf32> -> vector<4x384xf32>
    %c0_32 = arith.constant 0 : index
    %c0_33 = arith.constant 0 : index
    %30 = vector.load %arg3[%c0_32, %c0_33] : memref<4x1xf32, #tpu.memory_space<vmem>>, vector<4x1xf32>
    %31 = vector.broadcast %30 : vector<4x1xf32> to vector<4x384xf32>
    %32 = arith.addf %29, %31 : vector<4x384xf32>
    %c0_34 = arith.constant 0 : index
    %c0_35 = arith.constant 0 : index
    %c0_36 = arith.constant 0 : index
    %33 = vector.load %arg4[%c0_34, %c0_35, %c0_36] : memref<1x4x384xf32, #tpu.memory_space<vmem>>, vector<1x4x384xf32>
    %34 = vector.shape_cast %33 : vector<1x4x384xf32> to vector<4x384xf32>
    %35 = vector.shape_cast %32 : vector<4x384xf32> to vector<1x4x384xf32>
    tpu.vector_store %arg4[%c0_34, %c0_35, %c0_36], %35 {strides = array<i32>} : memref<1x4x384xf32, #tpu.memory_space<vmem>>, vector<1x4x384xf32>,
    return
  }
  func.func @transform_0(%arg0: i32) -> (i32, i32, i32) {
    %c0_i32 = arith.constant 0 : i32
    %c0_i32_0 = arith.constant 0 : i32
    %c0_i32_1 = arith.constant 0 : i32
    return %arg0, %c0_i32, %c0_i32_0 : i32, i32, i32
  }
  func.func @transform_1(%arg0: i32) -> (i32, i32) {
    %c0_i32 = arith.constant 0 : i32
    %c0_i32_0 = arith.constant 0 : i32
    %c0_i32_1 = arith.constant 0 : i32
    return %c0_i32, %c0_i32_0 : i32, i32
  }
  func.func @transform_2(%arg0: i32) -> (i32, i32) {
    %c0_i32 = arith.constant 0 : i32
    %c0_i32_0 = arith.constant 0 : i32
    %c0_i32_1 = arith.constant 0 : i32
    return %c0_i32, %c0_i32_0 : i32, i32
  }
  func.func @transform_3(%arg0: i32) -> (i32, i32, i32) {
    %c0_i32 = arith.constant 0 : i32
    %c0_i32_0 = arith.constant 0 : i32
    %c0_i32_1 = arith.constant 0 : i32
    return %arg0, %c0_i32, %c0_i32_0 : i32, i32, i32
  }
}

</mosaic_0001>

<bundles_post_ra>
// kernel: instconv2dv3_forward.1
= control target key start
LH: loop header
LB: loop body
LE: loop exit
PB: predicated region body
PF: predicated region fallthrough
CT: control target
= control target key end

     0   :  { %s697_s12 = smov 0   ;;  %s757_s0 = inlined_call_operand.vmem [shape: f32[2,8,512], index: 0, kind: input, shape index: {}]   ;;  %s758_s1 = inlined_call_operand.vmem [shape: f32[4,72], index: 1, kind: input, shape index: {}]   ;;  %s759_s2 = inlined_call_operand.vmem [shape: f32[4,1], index: 2, kind: input, shape index: {}]   ;;  %s760_s3 = inlined_call_operand.vmem [shape: f32[2,4,384], index: 3, kind: output, shape index: {}]  }
   0x1 LB: > { %s546_s13 = sadd.s32 4294967295, %s666_s12   ;;  %p550_p0 = scmp.ge.s32.totalorder %s666_s12, 1  ;;  %s666_s12 = sphi %s697_s12, %s13_s12  }
   0x2   : > { %p137_p1 = scmp.lt.s32.totalorder %s666_s12, 3 }
   0x4   : > { %p138_p2 = pnand %p550_p0, %p137_p1 }
   0x5   : > { %p161_p3 = scmp.lt.s32.totalorder (!%p138_p2), %s546_s13, 1  ;;  %s668_s18 = smov (!%p138_p2), 90  }
   0x6   : > { %141 = sbr.rel (%p138_p2) target bundleno = 310 (0x136), region = 32  ;;  %s669_s19 = smov (!%p138_p2), 91  }
   0x7   : > { %s670_s20 = smov (!%p138_p2), 92   ;;  %s671_s21 = smov (!%p138_p2), 108  }
   0x8   : > { %s672_s22 = smov (!%p138_p2), 109   ;;  %s673_s23 = smov (!%p138_p2), 110  }
   0x9   : > { %s674_s24 = smov (!%p138_p2), 126   ;;  %s675_s25 = smov (!%p138_p2), 127  }
   0xb   : > { %s762_s13 = smov (!%p161_p3, %s546_s13), 1  ;;  %vm375_vm0 = vcmask 736256   ;;  %vm349_vm1 = vcmask 744448   ;;  %vm323_vm2 = vcmask 752640   ;;  %vm297_vm3 = vcmask 883712  }
   0xc   : > { %s559_s14 = sshll.u32 %s762_s13, 5  ;;  %v413_v34 = vld [vmem:[%s759_s2] sm:$0xf]  ;;  %v676_v36 = vmov 0   ;;  %vm271_vm4 = vcmask 891904   ;;  %vm245_vm5 = vcmask 900096  }
   0xd   : > { %s165_s17 = scalar_lea.vmem %s757_s0, %s559_s14  ;;  %658 = vset.pattern.permute.xlu1 %v676_v36  ;;  %659 = vset.pattern.permute.xlu0 %v676_v36  ;;  %vm219_vm6 = vcmask 1031168   ;;  %vm193_vm7 = vcmask 1039360   ;;  %vm419_vm8 = vcmask 588800   ;;  %s560_s30 = smul.u32 12, %s762_s13  ;;  %vm486_vm9 = vcmask 1043456  }
   0xe   : > { %v711_v0 = vld [vmem:[%s165_s17 + $0x10] sm:$0xff]  ;;  %v362_v1 = vld [vmem:[%s165_s17 + $0x18] sm:$0xff]  ;;  %v713_v2 = vld [vmem:[%s165_s17] sm:$0xff] }
   0xf   : > { %v578_v3 = vpack.i.bf16 %v362_v1, %v711_v0  ;;  %v716_v4 = vld [vmem:[%s165_s17 + $0x8] sm:$0xff]  ;;  %s170_s6 = scalar_lea.vmem %s760_s3, %s560_s30 }
  0x10   : > { %v588_v5 = vpack.i.bf16 %v713_v2, %v716_v4 }
  0x11   : > { %579 = vrot.lane.b32.xlu0 %v578_v3, %s668_s18 }
  0x12   : > { %589 = vrot.lane.b32.xlu1 %v588_v5, %s668_s18  ;;  %599 = vrot.lane.b32.xlu2 %v588_v5, %s669_s19 }
  0x19   : > { %584 = vrot.lane.b32.xlu0 %v578_v3, %s669_s19 }
  0x1a   : > { %594 = vrot.lane.b32.xlu1 %v578_v3, %s670_s20  ;;  %604 = vrot.lane.b32.xlu2 %v578_v3, %s671_s21 }
  0x21   : > { %609 = vrot.lane.b32.xlu0 %v588_v5, %s670_s20 }
  0x22   : > { %614 = vrot.lane.b32.xlu1 %v578_v3, %s672_s22  ;;  %619 = vrot.lane.b32.xlu2 %v588_v5, %s671_s21 }
  0x29   : > { %624 = vrot.lane.b32.xlu0 %v578_v3, %s673_s23 }
  0x2a   : > { %629 = vrot.lane.b32.xlu1 %v588_v5, %s672_s22  ;;  %634 = vrot.lane.b32.xlu2 %v578_v3, %s674_s24 }
  0x31   : > { %639 = vrot.lane.b32.xlu0 %v588_v5, %s673_s23 }
  0x32   : > { %644 = vrot.lane.b32.xlu1 %v578_v3, %s675_s25  ;;  %649 = vrot.lane.b32.xlu2 %v588_v5, %s674_s24 }
  0x39   : > { %654 = vrot.lane.b32.xlu0 %v588_v5, %s675_s25 }
  0x3a   : > { %416 = vperm.xlu1 %658, %v413_v34  }
  0x6c   : > { %v600_v6 = vpop.permute.xlu2 %599 }
  0x6d   : > { %v602_v7 = vunpack.i.h.bf16 %v600_v6  ;;  %v601_v8 = vunpack.i.l.bf16 %v600_v6 }
  0x6f   : > { %v350_v19 = vsel %vm349_vm1, %v602_v7, %v601_v8 }
  0x74   : > { %v605_v10 = vpop.permute.xlu2 %604 }
  0x75   : > { %v607_v21 = vunpack.i.h.bf16 %v605_v10  ;;  %v606_v22 = vunpack.i.l.bf16 %v605_v10 }
  0x77   : > { %v300_v32 = vsel %vm297_vm3, %v606_v22, %v607_v21 }
  0x7c   : > { %v620_v28 = vpop.permute.xlu2 %619 }
  0x7d   : > { %v622_v33 = vunpack.i.h.bf16 %v620_v28  ;;  %v621_v37 = vunpack.i.l.bf16 %v620_v28 }
  0x7f   : > { %v298_v45 = vsel %vm297_vm3, %v622_v33, %v621_v37  ;;  %v299_v48 = vsel %vm297_vm3, %v621_v37, %v606_v22 }
  0x83   : > { %v580_v9 = vpop.permute.xlu0 %579 }
  0x84   : > { %v582_v11 = vunpack.i.h.bf16 %v580_v9  ;;  %v581_v12 = vunpack.i.l.bf16 %v580_v9  ;;  %v590_v13 = vpop.permute.xlu1 %589  ;;  %v635_v46 = vpop.permute.xlu2 %634 }
  0x85   : > { %v592_v14 = vunpack.i.h.bf16 %v590_v13  ;;  %v591_v15 = vunpack.i.l.bf16 %v590_v13  ;;  %v637_v49 = vunpack.i.h.bf16 %v635_v46  ;;  %v636_v50 = vunpack.i.l.bf16 %v635_v46 }
  0x86   : > { %v378_v16 = vsel %vm375_vm0, %v581_v12, %v582_v11 }
  0x87   : > { %v377_v17 = vsel %vm375_vm0, %v591_v15, %v581_v12  ;;  %470 = vmatpush.msra.mxu2 %v378_v16  ;;  %v376_v18 = vsel %vm375_vm0, %v592_v14, %v591_v15  ;;  %v222_v58 = vsel %vm219_vm6, %v636_v50, %v637_v49  ;;  %v385_v14 = vld [vmem:[%s758_s1] sm:$0xf] }
  0x88   : > { %450 = vmatpush.msra.mxu1 %v377_v17  ;;  %430 = vmatpush.msra.mxu0 %v376_v18 }
  0x8a   : > { %431 = vmatpush.msra.mxu0 %v350_v19 }
  0x8b   : > { %v585_v20 = vpop.permute.xlu0 %584 }
  0x8c   : > { %v587_v23 = vunpack.i.h.bf16 %v585_v20  ;;  %v586_v24 = vunpack.i.l.bf16 %v585_v20  ;;  %v595_v25 = vpop.permute.xlu1 %594  ;;  %v650_v61 = vpop.permute.xlu2 %649 }
  0x8d   : > { %v597_v26 = vunpack.i.h.bf16 %v595_v25  ;;  %v596_v27 = vunpack.i.l.bf16 %v595_v25  ;;  %v652_v62 = vunpack.i.h.bf16 %v650_v61  ;;  %v651_v1 = vunpack.i.l.bf16 %v650_v61 }
  0x8e   : > { %v351_v29 = vsel %vm349_vm1, %v601_v8, %v586_v24  ;;  %v352_v30 = vsel %vm349_vm1, %v586_v24, %v587_v23 }
  0x8f   : > { %451 = vmatpush.msra.mxu1 %v351_v29  ;;  %471 = vmatpush.msra.mxu2 %v352_v30  ;;  %v326_v31 = vsel %vm323_vm2, %v596_v27, %v597_v26  ;;  %v220_v11 = vsel %vm219_vm6, %v652_v62, %v651_v1  ;;  %v221_v13 = vsel %vm219_vm6, %v651_v1, %v636_v50 }
  0x91   : > { %472 = vmatpush.msra.mxu2 %v326_v31 }
  0x93   : > { %v610_v35 = vpop.permute.xlu0 %609  ;;  %473 = vmatpush.msra.mxu2 %v300_v32 }
  0x94   : > { %v612_v38 = vunpack.i.h.bf16 %v610_v35  ;;  %v611_v39 = vunpack.i.l.bf16 %v610_v35  ;;  %v615_v40 = vpop.permute.xlu1 %614 }
  0x95   : > { %v617_v41 = vunpack.i.h.bf16 %v615_v40  ;;  %v616_v42 = vunpack.i.l.bf16 %v615_v40 }
  0x96   : > { %v324_v43 = vsel %vm323_vm2, %v612_v38, %v611_v39  ;;  %v325_v44 = vsel %vm323_vm2, %v611_v39, %v596_v27 }
  0x97   : > { %432 = vmatpush.msra.mxu0 %v324_v43  ;;  %452 = vmatpush.msra.mxu1 %v325_v44  ;;  %v274_v47 = vsel %vm271_vm4, %v616_v42, %v617_v41 }
  0x98   : > { %474 = vmatpush.msra.mxu2 %v274_v47 }
  0x99   : > { %453 = vmatpush.msra.mxu1 %v299_v48  ;;  %433 = vmatpush.msra.mxu0 %v298_v45 }
  0x9b   : > { %v625_v51 = vpop.permute.xlu0 %624 }
  0x9c   : > { %v630_v52 = vpop.permute.xlu1 %629  ;;  %v627_v53 = vunpack.i.h.bf16 %v625_v51  ;;  %v626_v54 = vunpack.i.l.bf16 %v625_v51 }
  0x9d   : > { %v632_v55 = vunpack.i.h.bf16 %v630_v52  ;;  %v631_v56 = vunpack.i.l.bf16 %v630_v52 }
  0x9e   : > { %v248_v57 = vsel %vm245_vm5, %v626_v54, %v627_v53 }
  0x9f   : > { %v273_v59 = vsel %vm271_vm4, %v631_v56, %v616_v42  ;;  %475 = vmatpush.msra.mxu2 %v248_v57  ;;  %v272_v60 = vsel %vm271_vm4, %v632_v55, %v631_v56 }
  0xa0   : > { %454 = vmatpush.msra.mxu1 %v273_v59  ;;  %434 = vmatpush.msra.mxu0 %v272_v60 }
  0xa1   : > { %476 = vmatpush.msra.mxu2 %v222_v58 }
  0xa3   : > { %v640_v63 = vpop.permute.xlu0 %639 }
  0xa4   : > { %v642_v3 = vunpack.i.h.bf16 %v640_v63  ;;  %v641_v5 = vunpack.i.l.bf16 %v640_v63  ;;  %v645_v6 = vpop.permute.xlu1 %644 }
  0xa5   : > { %v647_v7 = vunpack.i.h.bf16 %v645_v6  ;;  %v646_v8 = vunpack.i.l.bf16 %v645_v6 }
  0xa6   : > { %v246_v9 = vsel %vm245_vm5, %v642_v3, %v641_v5  ;;  %v247_v10 = vsel %vm245_vm5, %v641_v5, %v626_v54 }
  0xa7   : > { %435 = vmatpush.msra.mxu0 %v246_v9  ;;  %455 = vmatpush.msra.mxu1 %v247_v10  ;;  %v196_v12 = vsel %vm193_vm7, %v646_v8, %v647_v7 }
  0xa8   : > { %477 = vmatpush.msra.mxu2 %v196_v12 }
  0xa9   : > { %456 = vmatpush.msra.mxu1 %v221_v13  ;;  %436 = vmatpush.msra.mxu0 %v220_v11 }
  0xaa   : > { %478 = vmatpush.msra.mxu2 %v711_v0 }
  0xab   : > { %v655_v15 = vpop.permute.xlu0 %654  ;;  %556 = vmatmul.msk.f32.vlgmr.msra.gmra.mxu2 %vm419_vm8, %v385_v14 }
  0xac   : > { %v657_v16 = vunpack.i.h.bf16 %v655_v15  ;;  %v656_v17 = vunpack.i.l.bf16 %v655_v15  ;;  %v417_v20 = vpop.permute.xlu1 %416 }
  0xae   : > { %v194_v18 = vsel %vm193_vm7, %v657_v16, %v656_v17  ;;  %v195_v19 = vsel %vm193_vm7, %v656_v17, %v646_v8 }
  0xaf   : > { %437 = vmatpush.msra.mxu0 %v194_v18  ;;  %457 = vmatpush.msra.mxu1 %v195_v19 }
  0xb1   : > { %438 = vmatpush.msra.mxu0 %v713_v2  ;;  %458 = vmatpush.msra.mxu1 %v716_v4 }
  0xb2   : > { %554 = vmatmul.msk.f32.vlgmr.msra.gmra.mxu0 %vm419_vm8, %v385_v14  ;;  %555 = vmatmul.msk.f32.vlgmr.msra.gmra.mxu1 %vm419_vm8, %v385_v14 }
 0x12e   : > { %v480_v0 = vpop.f32.mrf.mxu2 }
 0x12f   : > { %v440_v21 = vpop.f32.mrf.mxu0  ;;  %v460_v22 = vpop.f32.mrf.mxu1  ;;  %v481_v23 = vadd.f32 %v480_v0, %v417_v20 }
 0x130   : > { %v461_v24 = vadd.f32 %v460_v22, %v417_v20  ;;  %v441_v25 = vadd.f32 %v440_v21, %v417_v20 }
 0x131   : > { %490 = vst [vmem:[%s170_s6 + $0x8] sm:$0xf] %v481_v23 }
 0x132   : > { %v485_v26 = vrot.slane %v461_v24, 4 }
 0x134   : > { %v487_v2 = vsel %vm486_vm9, %v441_v25, %v485_v26 }
 0x135   : > { %489 = vst [vmem:[%s170_s6] sm:$0xff] %v487_v2 }
 0x136 PF: > { %s13_s12 = sadd.s32 1, %s666_s12  }
 0x137   : > { %p10_p4 = scmp.ge.s32.totalorder %s13_s12, 4  }
 0x139   :  { %12 = sbr.rel (!%p10_p4) target bundleno = 1 (0x1), region = 62 }

</bundles_post_ra>
